<compile_context>
chip_gen: v7x
topology: tpu7x:2x2x1
jax: 0.10.0
libtpu: 0.0.40
codegen_flags: <defaults>
</compile_context>

<pallas_src>
import functools

import jax
import jax.numpy as jnp
from jax.experimental import pallas as pl
from jax.experimental.pallas import tpu as pltpu


# ----------------------------------------------------------------------------- helpers
def _vmem_capacity_bytes():
    try:
        return int(pltpu.get_tpu_info().vmem_capacity_bytes)
    except Exception:
        return 64 * 1024 * 1024  # conservative (v7x-sized) default


def _default_seq_tile_target():
    # ~512 tokens/tile on 64 MiB VMEM (v7x), ~1024 on 128 MiB (v5e/v6e).
    return 512 if _vmem_capacity_bytes() <= 64 * 1024 * 1024 else 1024


def _pick_seq_tile(S, requested=None):
    target = requested if requested is not None else _default_seq_tile_target()
    target = max(8, min(target, S))
    if S <= target:
        return S
    for ts in range(target, 7, -1):  # largest multiple-of-8 divisor of S <= target
        if S % ts == 0 and ts % 8 == 0:
            return ts
    return S  # no clean tile: fall back to a single full-sequence block


def _round_up(n, m):
    return ((n + m - 1) // m) * m


# ----------------------------------------------------------------------------- kernels
def _condition_kernel(c_ref, wc_ref, bc_ref, wa_ref, ba_ref,
                      shift_ref, scale_ref, *, hidden: int):
    """Tiny batched conditioning path: shift/scale = adaLN(SiLU(c @ Wc + bc))."""
    cm = jnp.dot(c_ref[...], wc_ref[...], preferred_element_type=jnp.float32)
    cm = cm + bc_ref[...]                                   # (B, H) f32
    act = cm * (1.0 / (1.0 + jnp.exp(-cm)))                 # SiLU in f32 (EUP)
    mod = jnp.dot(act, wa_ref[...], preferred_element_type=jnp.float32)
    mod = mod + ba_ref[...]                                 # (B, 2H)
    shift_ref[...] = mod[:, :hidden]
    scale_ref[...] = mod[:, hidden:]


def _modulated_linear_kernel(x_ref,      # (1, TS, C_in)   mxu dtype (bf16)
                             shift_ref,  # (1, H)          f32
                             scale_ref,  # (1, H)          f32
                             wl_ref,     # (C_in, H)       mxu dtype
                             bl_ref,     # (1, H)          f32
                             wo_ref,     # (H, C_out_p)    mxu dtype
                             bo_ref,     # (1, C_out_p)    f32
                             o_ref,      # (1, TS, C_out_p)
                             *, eps: float):
    x = x_ref[0]                                            # (TS, C_in)

    # ---- token linear: bf16 x bf16 -> f32 accumulate (MXU native path) -------
    h = jnp.dot(x, wl_ref[...], preferred_element_type=jnp.float32)
    h = h + bl_ref[...]                                     # (TS, H) f32

    # ---- LayerNorm (no affine, eps inside rsqrt) in f32 ----------------------
    mu = jnp.mean(h, axis=-1, keepdims=True)
    var = jnp.mean(jnp.square(h - mu), axis=-1, keepdims=True)
    hn = (h - mu) * jax.lax.rsqrt(var + eps)                # (TS, H)

    # ---- modulate with precomputed per-batch shift/scale ---------------------
    hm = hn * (1.0 + scale_ref[...]) + shift_ref[...]       # (TS, H) f32

    # ---- output projection (lane-dense, padded C_out) ------------------------
    y = jnp.dot(hm.astype(wo_ref.dtype), wo_ref[...],
                preferred_element_type=jnp.float32)
    y = y + bo_ref[...]                                     # (TS, C_out_p)

    o_ref[0] = y.astype(o_ref.dtype)


# ----------------------------------------------------------------------------- wrapper
def modulated_linear_layer(x, c, params, *, eps=1e-6, seq_tile=None,
                           mxu_dtype=jnp.bfloat16, weight_buffers=1):
    """x: (B, S, C_in), c: (B, 1, C_cond) -> (B, S, C_out). f32 in/out."""
    B, S, C_in = x.shape
    C_cond = c.shape[-1]
    H = params["wl"].shape[1]
    C_out = params["wo"].shape[1]
    out_dtype = x.dtype

    # --- conditioning path: one well-shaped (B, C_cond) matmul, done once -----
    c2 = c.reshape(B, C_cond).astype(jnp.float32)           # == c.squeeze(1)
    shift, scale = pl.pallas_call(
        functools.partial(_condition_kernel, hidden=H),
        out_shape=(jax.ShapeDtypeStruct((B, H), jnp.float32),
                   jax.ShapeDtypeStruct((B, H), jnp.float32)),
    )(c2, params["wc"], params["bc"], params["wa"], params["ba"])

    # --- lane-dense output: pad C_out up to a multiple of 128 -----------------
    C_out_p = _round_up(C_out, 128)
    wl = params["wl"].astype(mxu_dtype)
    bl = params["bl"]
    wo = params["wo"].astype(mxu_dtype)
    bo = params["bo"]
    if C_out_p != C_out:
        wo = jnp.pad(wo, ((0, 0), (0, C_out_p - C_out)))
        bo = jnp.pad(bo, ((0, 0), (0, C_out_p - C_out)))
    x_mxu = x.astype(mxu_dtype)

    TS = _pick_seq_tile(S, seq_tile)
    grid = (B, S // TS)

    def wspec(shape):
        idx = lambda b, s, _n=len(shape): (0,) * _n
        if weight_buffers is None:
            return pl.BlockSpec(shape, idx)
        # Weights are revisited with the same block every step -> single buffer.
        return pl.BlockSpec(shape, idx, pipeline_mode=pl.Buffered(weight_buffers))

    itemsize = lambda a: jnp.dtype(a.dtype).itemsize
    cost = pl.CostEstimate(
        flops=int(2 * B * S * (C_in * H + H * C_out_p) + 10 * B * S * H),
        transcendentals=int(B * S),  # rsqrt per token
        bytes_accessed=int(
            x_mxu.size * itemsize(x_mxu)
            + wl.size * itemsize(wl) + wo.size * itemsize(wo)
            + (bl.size + bo.size + shift.size + scale.size) * 4
            + B * S * C_out_p * jnp.dtype(out_dtype).itemsize),
    )

    out = pl.pallas_call(
        functools.partial(_modulated_linear_kernel, eps=eps),
        out_shape=jax.ShapeDtypeStruct((B, S, C_out_p), out_dtype),
        grid_spec=pltpu.PrefetchScalarGridSpec(
            num_scalar_prefetch=0,
            grid=grid,
            in_specs=[
                pl.BlockSpec((1, TS, C_in), lambda b, s: (b, s, 0)),
                pl.BlockSpec((1, H), lambda b, s: (b, 0)),
                pl.BlockSpec((1, H), lambda b, s: (b, 0)),
                wspec((C_in, H)),
                wspec((1, H)),
                wspec((H, C_out_p)),
                wspec((1, C_out_p)),
            ],
            out_specs=pl.BlockSpec((1, TS, C_out_p), lambda b, s: (b, s, 0)),
        ),
        compiler_params=pltpu.CompilerParams(
            dimension_semantics=("parallel", "parallel"),
            vmem_limit_bytes=int(_vmem_capacity_bytes() * 3 // 4),
        ),
        cost_estimate=cost,
    )(x_mxu, shift, scale, wl, bl, wo, bo)

    if C_out_p != C_out:
        out = out[..., :C_out]
    return out


# ----------------------------------------------------------------------------- reference
def _reference(x, c, params, *, eps=1e-6, mxu_dtype=jnp.bfloat16):
    """Plain-JAX reference mirroring the PyTorch forward (and the kernel's
    bf16-operand / f32-accumulate matmul numerics)."""
    B = x.shape[0]
    H = params["wl"].shape[1]
    wl = params["wl"].astype(mxu_dtype)
    wo = params["wo"].astype(mxu_dtype)
    h = jnp.dot(x.astype(mxu_dtype), wl,
                preferred_element_type=jnp.float32) + params["bl"][0]      # (B,S,H)
    cm = c.reshape(B, -1) @ params["wc"] + params["bc"][0]                 # (B,H)
    act = cm * (1.0 / (1.0 + jnp.exp(-cm)))
    mod = act @ params["wa"] + params["ba"][0]                             # (B,2H)
    shift, scale = mod[:, :H], mod[:, H:]
    mu = jnp.mean(h, axis=-1, keepdims=True)
    var = jnp.mean(jnp.square(h - mu), axis=-1, keepdims=True)
    hn = (h - mu) * jax.lax.rsqrt(var + eps)
    hm = hn * (1.0 + scale[:, None, :]) + shift[:, None, :]
    y = jnp.dot(hm.astype(mxu_dtype), wo,
                preferred_element_type=jnp.float32) + params["bo"][0]
    return y.astype(x.dtype)


def init_params(key, in_channels, hidden, cond, out_channels):
    ks = jax.random.split(key, 8)
    s = lambda k, shape, fan_in: (jax.random.normal(k, shape, jnp.float32)
                                  / jnp.sqrt(jnp.float32(fan_in)))
    return {
        "wl": s(ks[0], (in_channels, hidden), in_channels),
        "bl": s(ks[1], (1, hidden), hidden),
        "wc": s(ks[2], (cond, hidden), cond),
        "bc": s(ks[3], (1, hidden), hidden),
        "wa": s(ks[4], (hidden, 2 * hidden), hidden),
        "ba": s(ks[5], (1, 2 * hidden), hidden),
        "wo": s(ks[6], (hidden, out_channels), hidden),
        "bo": s(ks[7], (1, out_channels), out_channels),
    }


if __name__ == "__main__":
    # Small shapes consistent with the module (scaled-down defaults).
    B, S = 2, 16
    in_channels, hidden, cond, out_channels = 8, 32, 64, 3

    key = jax.random.PRNGKey(0)
    kx, kc, kp = jax.random.split(key, 3)

    x = jax.random.normal(kx, (B, S, in_channels), jnp.float32)
    c = jax.random.normal(kc, (B, 1, cond), jnp.float32)
    params = init_params(kp, in_channels, hidden, cond, out_channels)

    def run(weight_buffers):
        out = modulated_linear_layer(x, c, params, weight_buffers=weight_buffers)
        return jax.block_until_ready(out)

    try:
        y = run(1)        # single-buffered resident weights (pl.Buffered(1))
    except Exception:
        y = run(None)     # fallback: default double-buffered weight blocks

    y_ref = _reference(x, c, params)
    assert y.shape == (B, S, out_channels)
    assert jnp.allclose(y, y_ref, atol=2e-3, rtol=2e-3), "mismatch vs reference"

    print("KERNEL_OK")
</pallas_src>

<mosaic_0001>
module attributes {stable_mosaic.version = 11 : i64} {
  func.func @_condition_kernel(%arg0: memref<2x64xf32, #tpu.memory_space<vmem>>, %arg1: memref<64x32xf32, #tpu.memory_space<vmem>>, %arg2: memref<1x32xf32, #tpu.memory_space<vmem>>, %arg3: memref<32x64xf32, #tpu.memory_space<vmem>>, %arg4: memref<1x64xf32, #tpu.memory_space<vmem>>, %arg5: memref<2x32xf32, #tpu.memory_space<vmem>>, %arg6: memref<2x32xf32, #tpu.memory_space<vmem>>) attributes {dimension_semantics = [], scalar_prefetch = 0 : i64, scratch_operands = 0 : i64, tpu.core_type = #tpu.core_type<tc>} {
    %c0 = arith.constant 0 : index
    %c0_0 = arith.constant 0 : index
    %0 = vector.load %arg0[%c0, %c0_0] : memref<2x64xf32, #tpu.memory_space<vmem>>, vector<2x64xf32>
    %c0_1 = arith.constant 0 : index
    %c0_2 = arith.constant 0 : index
    %1 = vector.load %arg1[%c0_1, %c0_2] : memref<64x32xf32, #tpu.memory_space<vmem>>, vector<64x32xf32>
    %cst = arith.constant dense<0.000000e+00> : vector<2x32xf32>
    %2 = tpu.matmul %0, %1, %cst {dimension_numbers = #tpu.dot_dimension_numbers<[1], [0], [0], [1], [0, 0, 1, 1], [], []>} : vector<2x64xf32>, vector<64x32xf32>, vector<2x32xf32> -> vector<2x32xf32>
    %c0_3 = arith.constant 0 : index
    %c0_4 = arith.constant 0 : index
    %3 = vector.load %arg2[%c0_3, %c0_4] : memref<1x32xf32, #tpu.memory_space<vmem>>, vector<1x32xf32>
    %4 = vector.broadcast %3 : vector<1x32xf32> to vector<2x32xf32>
    %5 = arith.addf %2, %4 : vector<2x32xf32>
    %cst_5 = arith.constant 0.000000e+00 : f32
    %6 = vector.broadcast %cst_5 : f32 to vector<2x32xf32>
    %7 = arith.subf %6, %5 : vector<2x32xf32>
    %8 = math.exp %7 : vector<2x32xf32>
    %cst_6 = arith.constant 1.000000e+00 : f32
    %9 = vector.broadcast %cst_6 : f32 to vector<2x32xf32>
    %10 = arith.addf %9, %8 : vector<2x32xf32>
    %cst_7 = arith.constant 1.000000e+00 : f32
    %11 = vector.broadcast %cst_7 : f32 to vector<2x32xf32>
    %12 = arith.divf %11, %10 : vector<2x32xf32>
    %13 = arith.mulf %5, %12 : vector<2x32xf32>
    %c0_8 = arith.constant 0 : index
    %c0_9 = arith.constant 0 : index
    %14 = vector.load %arg3[%c0_8, %c0_9] : memref<32x64xf32, #tpu.memory_space<vmem>>, vector<32x64xf32>
    %cst_10 = arith.constant dense<0.000000e+00> : vector<2x64xf32>
    %15 = tpu.matmul %13, %14, %cst_10 {dimension_numbers = #tpu.dot_dimension_numbers<[1], [0], [0], [1], [0, 0, 1, 1], [], []>} : vector<2x32xf32>, vector<32x64xf32>, vector<2x64xf32> -> vector<2x64xf32>
    %c0_11 = arith.constant 0 : index
    %c0_12 = arith.constant 0 : index
    %16 = vector.load %arg4[%c0_11, %c0_12] : memref<1x64xf32, #tpu.memory_space<vmem>>, vector<1x64xf32>
    %17 = vector.broadcast %16 : vector<1x64xf32> to vector<2x64xf32>
    %18 = arith.addf %15, %17 : vector<2x64xf32>
    %19 = vector.extract_strided_slice %18 {offsets = [0, 0], sizes = [2, 32], strides = [1, 1]} : vector<2x64xf32> to vector<2x32xf32>
    %c0_13 = arith.constant 0 : index
    %c0_14 = arith.constant 0 : index
    %20 = vector.load %arg5[%c0_13, %c0_14] : memref<2x32xf32, #tpu.memory_space<vmem>>, vector<2x32xf32>
    tpu.vector_store %arg5[%c0_13, %c0_14], %19 {strides = array<i32>} : memref<2x32xf32, #tpu.memory_space<vmem>>, vector<2x32xf32>,
    %21 = vector.extract_strided_slice %18 {offsets = [0, 32], sizes = [2, 32], strides = [1, 1]} : vector<2x64xf32> to vector<2x32xf32>
    %c0_15 = arith.constant 0 : index
    %c0_16 = arith.constant 0 : index
    %22 = vector.load %arg6[%c0_15, %c0_16] : memref<2x32xf32, #tpu.memory_space<vmem>>, vector<2x32xf32>
    tpu.vector_store %arg6[%c0_15, %c0_16], %21 {strides = array<i32>} : memref<2x32xf32, #tpu.memory_space<vmem>>, vector<2x32xf32>,
    return
  }
}

module attributes {stable_mosaic.version = 11 : i64} {
  func.func @_condition_kernel(%arg0: memref<2x64xf32, #tpu.memory_space<vmem>>, %arg1: memref<64x32xf32, #tpu.memory_space<vmem>>, %arg2: memref<1x32xf32, #tpu.memory_space<vmem>>, %arg3: memref<32x64xf32, #tpu.memory_space<vmem>>, %arg4: memref<1x64xf32, #tpu.memory_space<vmem>>, %arg5: memref<2x32xf32, #tpu.memory_space<vmem>>, %arg6: memref<2x32xf32, #tpu.memory_space<vmem>>) attributes {dimension_semantics = [], scalar_prefetch = 0 : i64, scratch_operands = 0 : i64, tpu.core_type = #tpu.core_type<tc>} {
    %c0 = arith.constant 0 : index
    %c0_0 = arith.constant 0 : index
    %0 = vector.load %arg0[%c0, %c0_0] : memref<2x64xf32, #tpu.memory_space<vmem>>, vector<2x64xf32>
    %c0_1 = arith.constant 0 : index
    %c0_2 = arith.constant 0 : index
    %1 = vector.load %arg1[%c0_1, %c0_2] : memref<64x32xf32, #tpu.memory_space<vmem>>, vector<64x32xf32>
    %cst = arith.constant dense<0.000000e+00> : vector<2x32xf32>
    %2 = tpu.matmul %0, %1, %cst {dimension_numbers = #tpu.dot_dimension_numbers<[1], [0], [0], [1], [0, 0, 1, 1], [], []>} : vector<2x64xf32>, vector<64x32xf32>, vector<2x32xf32> -> vector<2x32xf32>
    %c0_3 = arith.constant 0 : index
    %c0_4 = arith.constant 0 : index
    %3 = vector.load %arg2[%c0_3, %c0_4] : memref<1x32xf32, #tpu.memory_space<vmem>>, vector<1x32xf32>
    %4 = vector.broadcast %3 : vector<1x32xf32> to vector<2x32xf32>
    %5 = arith.addf %2, %4 : vector<2x32xf32>
    %cst_5 = arith.constant 0.000000e+00 : f32
    %6 = vector.broadcast %cst_5 : f32 to vector<2x32xf32>
    %7 = arith.subf %6, %5 : vector<2x32xf32>
    %8 = math.exp %7 : vector<2x32xf32>
    %cst_6 = arith.constant 1.000000e+00 : f32
    %9 = vector.broadcast %cst_6 : f32 to vector<2x32xf32>
    %10 = arith.addf %9, %8 : vector<2x32xf32>
    %cst_7 = arith.constant 1.000000e+00 : f32
    %11 = vector.broadcast %cst_7 : f32 to vector<2x32xf32>
    %12 = arith.divf %11, %10 : vector<2x32xf32>
    %13 = arith.mulf %5, %12 : vector<2x32xf32>
    %c0_8 = arith.constant 0 : index
    %c0_9 = arith.constant 0 : index
    %14 = vector.load %arg3[%c0_8, %c0_9] : memref<32x64xf32, #tpu.memory_space<vmem>>, vector<32x64xf32>
    %cst_10 = arith.constant dense<0.000000e+00> : vector<2x64xf32>
    %15 = tpu.matmul %13, %14, %cst_10 {dimension_numbers = #tpu.dot_dimension_numbers<[1], [0], [0], [1], [0, 0, 1, 1], [], []>} : vector<2x32xf32>, vector<32x64xf32>, vector<2x64xf32> -> vector<2x64xf32>
    %c0_11 = arith.constant 0 : index
    %c0_12 = arith.constant 0 : index
    %16 = vector.load %arg4[%c0_11, %c0_12] : memref<1x64xf32, #tpu.memory_space<vmem>>, vector<1x64xf32>
    %17 = vector.broadcast %16 : vector<1x64xf32> to vector<2x64xf32>
    %18 = arith.addf %15, %17 : vector<2x64xf32>
    %19 = vector.extract_strided_slice %18 {offsets = [0, 0], sizes = [2, 32], strides = [1, 1]} : vector<2x64xf32> to vector<2x32xf32>
    %c0_13 = arith.constant 0 : index
    %c0_14 = arith.constant 0 : index
    %20 = vector.load %arg5[%c0_13, %c0_14] : memref<2x32xf32, #tpu.memory_space<vmem>>, vector<2x32xf32>
    tpu.vector_store %arg5[%c0_13, %c0_14], %19 {strides = array<i32>} : memref<2x32xf32, #tpu.memory_space<vmem>>, vector<2x32xf32>,
    %21 = vector.extract_strided_slice %18 {offsets = [0, 32], sizes = [2, 32], strides = [1, 1]} : vector<2x64xf32> to vector<2x32xf32>
    %c0_15 = arith.constant 0 : index
    %c0_16 = arith.constant 0 : index
    %22 = vector.load %arg6[%c0_15, %c0_16] : memref<2x32xf32, #tpu.memory_space<vmem>>, vector<2x32xf32>
    tpu.vector_store %arg6[%c0_15, %c0_16], %21 {strides = array<i32>} : memref<2x32xf32, #tpu.memory_space<vmem>>, vector<2x32xf32>,
    return
  }
}

</mosaic_0001>

<bundles_post_ra>
// kernel: tpu_custom_call.1
= control target key start
LH: loop header
LB: loop body
LE: loop exit
PB: predicated region body
PF: predicated region fallthrough
CT: control target
= control target key end

     0   :  { %12 = vsyncpa [#allocation3], 0  ;;  %v365_v3 = vmov 0.0|0.0   ;;  %vm366_vm0 = vmmov 0   ;;  %v367_v6 = vmov 0.0   ;;  %s477_s0 = inlined_call_operand.vmem [shape: f32[2,64], index: 0, kind: input, shape index: {}]   ;;  %s478_s1 = inlined_call_operand.vmem [shape: f32[64,32], index: 1, kind: input, shape index: {}]   ;;  %s479_s2 = inlined_call_operand.vmem [shape: f32[1,32], index: 2, kind: input, shape index: {}]   ;;  %s480_s3 = inlined_call_operand.vmem [shape: f32[32,64], index: 3, kind: input, shape index: {}]   ;;  %s481_s4 = inlined_call_operand.vmem [shape: f32[1,64], index: 4, kind: input, shape index: {}]   ;;  %s482_s5 = inlined_call_operand.hbm [shape: f32[2,32], index: 5, kind: output, shape index: {0}]   ;;  %s483_s6 = inlined_call_operand.hbm [shape: f32[2,32], index: 6, kind: output, shape index: {1}]  }
   0x1   :  { %v25_v0 = vld [vmem:[%s478_s1] sm:$0xff]  ;;  %v26_v1 = vld [vmem:[%s478_s1 + $0x8] sm:$0xff]  ;;  %v27_v2 = vld [vmem:[%s478_s1 + $0x10] sm:$0xff]  ;;  %289 = vmatprep.subr.bf16.mxu0 %v365_v3  ;;  %275 = vmatprep.mubr.msk.f32.mxu0 %vm366_vm0, %v367_v6 }
   0x2   :  { %v290_v4 = vpack.c.bf16 %v26_v1, %v25_v0  ;;  %v28_v5 = vld [vmem:[%s478_s1 + $0x18] sm:$0xff]  ;;  %301 = vmatprep.subr.bf16.mxu1 %v365_v3  ;;  %286 = vmatprep.mubr.msk.f32.mxu1 %vm366_vm0, %v367_v6 }
   0x3   :  { %v293_v7 = vpack.c.bf16 %v28_v5, %v27_v2 }
   0x4   :  { %291 = vmatpush3.bf16.msra.mxu0 %v290_v4 }
   0x5   :  { %13 = vsyncpa [#allocation5], 0  ;;  %292 = vmatprep.subr.bf16.mxu0 %v365_v3  ;;  %v29_v8 = vld [vmem:[%s478_s1 + $0x20] sm:$0xff]  ;;  %v30_v9 = vld [vmem:[%s478_s1 + $0x28] sm:$0xff]  ;;  %vm40_vm1 = vcmask 523264   ;;  %vm132_vm2 = vcmask 261120  }
   0x6   :  { %v296_v10 = vpack.c.bf16 %v30_v9, %v29_v8  ;;  %v31_v11 = vld [vmem:[%s478_s1 + $0x30] sm:$0xff]  ;;  %v32_v12 = vld [vmem:[%s478_s1 + $0x38] sm:$0xff]  ;;  %v24_v14 = vld [vmem:[%s477_s0] sm:$0x3]  ;;  %s368_s24 = smov [#allocation2]   ;;  %vm206_vm3 = vcmask 254976  }
   0x7   :  { %v299_v13 = vpack.c.bf16 %v32_v12, %v31_v11  ;;  %v121_v15 = vld [vmem:[%s480_s3] sm:$0xff]  ;;  %v122_v16 = vld [vmem:[%s480_s3 + $0x8] sm:$0xff]  ;;  %v123_v18 = vld [vmem:[%s480_s3 + $0x10] sm:$0xff]  ;;  %s219_s25 = sshll.u32 %s368_s24, 4  ;;  %s220_s25 = int_to_ptr.vmem [resolvable:$true] %s219_s25 }
   0x8   :  { %294 = vmatpush3.bf16.msra.mxu0 %v293_v7  ;;  %v302_v17 = vpack.c.bf16 %v122_v16, %v121_v15  ;;  %v124_v19 = vld [vmem:[%s480_s3 + $0x18] sm:$0xff]  ;;  %v241_v21 = vld [vmem:[%s479_s2] ss:$0 sm:$0xff]  ;;  %s369_s2 = smov 96   ;;  %s317_s26 = scalar_lea.vmem %s220_s25, 32 }
   0x9   :  { %295 = vmatprep.subr.bf16.mxu0 %v365_v3  ;;  %v305_v20 = vpack.c.bf16 %v124_v19, %v123_v18  ;;  %v243_v31 = vld [vmem:[%s481_s4] ss:$0 sm:$0xff]  ;;  %p318_p0 = scmp.ne.s32.totalorder %s220_s25, %s317_s26  ;;  %p322_p1 = scmp.lt.s32.totalorder %s220_s25, %s220_s25 }
   0xa   :  { %303 = vmatpush3.bf16.msra.mxu1 %v302_v17  ;;  %p323_p2 = scmp.lt.s32.totalorder %s317_s26, %s317_s26 }
   0xb   :  { %304 = vmatprep.subr.bf16.mxu1 %v365_v3 }
   0xc   :  { %297 = vmatpush3.bf16.msra.mxu0 %v296_v10  ;;  %p324_p3 = por %p323_p2, %p322_p1 }
   0xd   :  { %298 = vmatprep.subr.bf16.mxu0 %v365_v3 }
   0xe   :  { %306 = vmatpush3.bf16.msra.mxu1 %v305_v20  ;;  %p325_p4 = pnand %p324_p3, %p318_p0 }
  0x10   :  { %300 = vmatpush3.bf16.msra.mxu0 %v299_v13 }
  0x13   :  { %276 = vmatmul.mubr.msk.f32.vlgmr.msra.gmra.mrb[0].mxu0 %vm40_vm1, %v24_v14 }
  0xe6   :  { %v110_v22 = vpop.f32.mrb[0].mxu0 }
  0xe7   :  { %v111_v23 = vadd.f32 %v241_v21, %v110_v22  ;;  %v277_v24 = vpop.f32.mrb[1].mxu0 }
  0xe9   :  { %v114_v25 = vsub.f32 0.0, %v111_v23 }
  0xeb   :  { %v115_v26 = vmul.f32 1.442695, %v114_v25 }
  0xed   :  { %313 = vpow2.f32 %v115_v26 }
  0xf7   :  { %v314_v27 = vpop.eup %313 }
  0xf8   :  { %v117_v28 = vadd.f32 1.0, %v314_v27 }
  0xfa   :  { %315 = vrcp.f32 %v117_v28 }
 0x104   :  { %v316_v29 = vpop.eup %315 }
 0x105   :  { %v120_v30 = vmul.f32 %v316_v29, %v111_v23 }
 0x107   :  { %287 = vmatmul.mubr.msk.f32.vlgmr.msra.gmra.mrb[0].mxu1 %vm132_vm2, %v120_v30 }
 0x1da   :  { %v202_v32 = vpop.f32.mrb[0].mxu1 }
 0x1db   :  { %v203_v33 = vadd.f32 %v243_v31, %v202_v32  ;;  %v288_v34 = vpop.f32.mrb[1].mxu1 }
 0x1dd   :  { %209 = vrot.lane.b32.xlu0 %v203_v33, %s369_s2  ;;  %207 = vst.msk [vmem:[#allocation2] sm:$0x3] %vm206_vm3, %v203_v33 }
 0x1de   :  { %328 = shalt.err (!%p325_p4)
}
 0x1df   :  { %s329_s28 = scalar_lea.hbm %s482_s5, 32 }
 0x1e0   :  { %p330_p5 = scmp.ne.s32.totalorder %s482_s5, %s329_s28  ;;  %p333_p6 = scmp.lt.u32.totalorder %s329_s28, %s482_s5 }
 0x1e2   :  { %p335_p7 = pnand %p333_p6, %p330_p5 }
 0x1e4   :  { %338 = shalt.err (!%p335_p7)
}
 0x1e5   :  { %222 = dma.vmem_to_hbm [thread:$0]  %s220_s25, 32, %s482_s5, [#allocation3]  }
 0x1e6   :  { %s370_s11 = smov [#allocation4]  }
 0x1e7   :  { %s229_s12 = sshll.u32 %s370_s11, 4  ;;  %s230_s12 = int_to_ptr.vmem [resolvable:$true] %s229_s12 }
 0x1e8   :  { %s339_s13 = scalar_lea.vmem %s230_s12, 32  ;;  %p344_p9 = scmp.lt.s32.totalorder %s230_s12, %s230_s12 }
 0x1e9   :  { %p340_p8 = scmp.ne.s32.totalorder %s230_s12, %s339_s13  ;;  %p345_p10 = scmp.lt.s32.totalorder %s339_s13, %s339_s13 }
 0x1eb   :  { %p346_p11 = por %p345_p10, %p344_p9 }
 0x1ed   :  { %p347_p12 = pnand %p346_p11, %p340_p8 }
 0x24f   :  { %v210_v35 = vpop.permute.xlu0 %209 }
 0x250   :  { %212 = vst.msk [vmem:[#allocation4] sm:$0x3] %vm206_vm3, %v210_v35 }
 0x251   :  { %350 = shalt.err (!%p347_p12)
}
 0x252   :  { %s351_s16 = scalar_lea.hbm %s483_s6, 32 }
 0x253   :  { %p352_p13 = scmp.ne.s32.totalorder %s483_s6, %s351_s16  ;;  %p355_p0 = scmp.lt.u32.totalorder %s351_s16, %s483_s6 }
 0x255   :  { %p357_p1 = pnand %p355_p0, %p352_p13 }
 0x257   :  { %360 = shalt.err (!%p357_p1)
}
 0x258   :  { %232 = dma.vmem_to_hbm [thread:$0]  %s230_s12, 32, %s483_s6, [#allocation5]  }
 0x259   :  { %361 = dma.done.wait [#allocation3], 32  }
 0x25a   :  { %362 = vsyncadd [#allocation3], 4294967264 }
 0x25b   :  { %363 = dma.done.wait [#allocation5], 32  }
 0x25c   :  { %364 = vsyncadd [#allocation5], 4294967264 }
 0x25d   :  { %239 = vsyncpa [#allocation3], 1 }
 0x25e   :  { %240 = vsyncpa [#allocation5], 1 }

// kernel: tpu_custom_call.1
= control target key start
LH: loop header
LB: loop body
LE: loop exit
PB: predicated region body
PF: predicated region fallthrough
CT: control target
= control target key end

     0   :  { %12 = vsyncpa [#allocation3], 0  ;;  %v365_v3 = vmov 0.0|0.0   ;;  %vm366_vm0 = vmmov 0   ;;  %v367_v6 = vmov 0.0   ;;  %s477_s0 = inlined_call_operand.vmem [shape: f32[2,64], index: 0, kind: input, shape index: {}]   ;;  %s478_s1 = inlined_call_operand.vmem [shape: f32[64,32], index: 1, kind: input, shape index: {}]   ;;  %s479_s2 = inlined_call_operand.vmem [shape: f32[1,32], index: 2, kind: input, shape index: {}]   ;;  %s480_s3 = inlined_call_operand.vmem [shape: f32[32,64], index: 3, kind: input, shape index: {}]   ;;  %s481_s4 = inlined_call_operand.vmem [shape: f32[1,64], index: 4, kind: input, shape index: {}]   ;;  %s482_s5 = inlined_call_operand.hbm [shape: f32[2,32], index: 5, kind: output, shape index: {0}]   ;;  %s483_s6 = inlined_call_operand.hbm [shape: f32[2,32], index: 6, kind: output, shape index: {1}]  }
   0x1   :  { %v25_v0 = vld [vmem:[%s478_s1] sm:$0xff]  ;;  %v26_v1 = vld [vmem:[%s478_s1 + $0x8] sm:$0xff]  ;;  %v27_v2 = vld [vmem:[%s478_s1 + $0x10] sm:$0xff]  ;;  %289 = vmatprep.subr.bf16.mxu0 %v365_v3  ;;  %275 = vmatprep.mubr.msk.f32.mxu0 %vm366_vm0, %v367_v6 }
   0x2   :  { %v290_v4 = vpack.c.bf16 %v26_v1, %v25_v0  ;;  %v28_v5 = vld [vmem:[%s478_s1 + $0x18] sm:$0xff]  ;;  %301 = vmatprep.subr.bf16.mxu1 %v365_v3  ;;  %286 = vmatprep.mubr.msk.f32.mxu1 %vm366_vm0, %v367_v6 }
   0x3   :  { %v293_v7 = vpack.c.bf16 %v28_v5, %v27_v2 }
   0x4   :  { %291 = vmatpush3.bf16.msra.mxu0 %v290_v4 }
   0x5   :  { %13 = vsyncpa [#allocation5], 0  ;;  %292 = vmatprep.subr.bf16.mxu0 %v365_v3  ;;  %v29_v8 = vld [vmem:[%s478_s1 + $0x20] sm:$0xff]  ;;  %v30_v9 = vld [vmem:[%s478_s1 + $0x28] sm:$0xff]  ;;  %vm40_vm1 = vcmask 523264   ;;  %vm132_vm2 = vcmask 261120  }
   0x6   :  { %v296_v10 = vpack.c.bf16 %v30_v9, %v29_v8  ;;  %v31_v11 = vld [vmem:[%s478_s1 + $0x30] sm:$0xff]  ;;  %v32_v12 = vld [vmem:[%s478_s1 + $0x38] sm:$0xff]  ;;  %v24_v14 = vld [vmem:[%s477_s0] sm:$0x3]  ;;  %s368_s24 = smov [#allocation2]   ;;  %vm206_vm3 = vcmask 254976  }
   0x7   :  { %v299_v13 = vpack.c.bf16 %v32_v12, %v31_v11  ;;  %v121_v15 = vld [vmem:[%s480_s3] sm:$0xff]  ;;  %v122_v16 = vld [vmem:[%s480_s3 + $0x8] sm:$0xff]  ;;  %v123_v18 = vld [vmem:[%s480_s3 + $0x10] sm:$0xff]  ;;  %s219_s25 = sshll.u32 %s368_s24, 4  ;;  %s220_s25 = int_to_ptr.vmem [resolvable:$true] %s219_s25 }
   0x8   :  { %294 = vmatpush3.bf16.msra.mxu0 %v293_v7  ;;  %v302_v17 = vpack.c.bf16 %v122_v16, %v121_v15  ;;  %v124_v19 = vld [vmem:[%s480_s3 + $0x18] sm:$0xff]  ;;  %v241_v21 = vld [vmem:[%s479_s2] ss:$0 sm:$0xff]  ;;  %s369_s2 = smov 96   ;;  %s317_s26 = scalar_lea.vmem %s220_s25, 32 }
   0x9   :  { %295 = vmatprep.subr.bf16.mxu0 %v365_v3  ;;  %v305_v20 = vpack.c.bf16 %v124_v19, %v123_v18  ;;  %v243_v31 = vld [vmem:[%s481_s4] ss:$0 sm:$0xff]  ;;  %p318_p0 = scmp.ne.s32.totalorder %s220_s25, %s317_s26  ;;  %p322_p1 = scmp.lt.s32.totalorder %s220_s25, %s220_s25 }
   0xa   :  { %303 = vmatpush3.bf16.msra.mxu1 %v302_v17  ;;  %p323_p2 = scmp.lt.s32.totalorder %s317_s26, %s317_s26 }
   0xb   :  { %304 = vmatprep.subr.bf16.mxu1 %v365_v3 }
   0xc   :  { %297 = vmatpush3.bf16.msra.mxu0 %v296_v10  ;;  %p324_p3 = por %p323_p2, %p322_p1 }
   0xd   :  { %298 = vmatprep.subr.bf16.mxu0 %v365_v3 }
   0xe   :  { %306 = vmatpush3.bf16.msra.mxu1 %v305_v20  ;;  %p325_p4 = pnand %p324_p3, %p318_p0 }
  0x10   :  { %300 = vmatpush3.bf16.msra.mxu0 %v299_v13 }
  0x13   :  { %276 = vmatmul.mubr.msk.f32.vlgmr.msra.gmra.mrb[0].mxu0 %vm40_vm1, %v24_v14 }
  0xe6   :  { %v110_v22 = vpop.f32.mrb[0].mxu0 }
  0xe7   :  { %v111_v23 = vadd.f32 %v241_v21, %v110_v22  ;;  %v277_v24 = vpop.f32.mrb[1].mxu0 }
  0xe9   :  { %v114_v25 = vsub.f32 0.0, %v111_v23 }
  0xeb   :  { %v115_v26 = vmul.f32 1.442695, %v114_v25 }
  0xed   :  { %313 = vpow2.f32 %v115_v26 }
  0xf7   :  { %v314_v27 = vpop.eup %313 }
  0xf8   :  { %v117_v28 = vadd.f32 1.0, %v314_v27 }
  0xfa   :  { %315 = vrcp.f32 %v117_v28 }
 0x104   :  { %v316_v29 = vpop.eup %315 }
 0x105   :  { %v120_v30 = vmul.f32 %v316_v29, %v111_v23 }
 0x107   :  { %287 = vmatmul.mubr.msk.f32.vlgmr.msra.gmra.mrb[0].mxu1 %vm132_vm2, %v120_v30 }
 0x1da   :  { %v202_v32 = vpop.f32.mrb[0].mxu1 }
 0x1db   :  { %v203_v33 = vadd.f32 %v243_v31, %v202_v32  ;;  %v288_v34 = vpop.f32.mrb[1].mxu1 }
 0x1dd   :  { %209 = vrot.lane.b32.xlu0 %v203_v33, %s369_s2  ;;  %207 = vst.msk [vmem:[#allocation2] sm:$0x3] %vm206_vm3, %v203_v33 }
 0x1de   :  { %328 = shalt.err (!%p325_p4)
}
 0x1df   :  { %s329_s28 = scalar_lea.hbm %s482_s5, 32 }
 0x1e0   :  { %p330_p5 = scmp.ne.s32.totalorder %s482_s5, %s329_s28  ;;  %p333_p6 = scmp.lt.u32.totalorder %s329_s28, %s482_s5 }
 0x1e2   :  { %p335_p7 = pnand %p333_p6, %p330_p5 }
 0x1e4   :  { %338 = shalt.err (!%p335_p7)
}
 0x1e5   :  { %222 = dma.vmem_to_hbm [thread:$0]  %s220_s25, 32, %s482_s5, [#allocation3]  }
 0x1e6   :  { %s370_s11 = smov [#allocation4]  }
 0x1e7   :  { %s229_s12 = sshll.u32 %s370_s11, 4  ;;  %s230_s12 = int_to_ptr.vmem [resolvable:$true] %s229_s12 }
 0x1e8   :  { %s339_s13 = scalar_lea.vmem %s230_s12, 32  ;;  %p344_p9 = scmp.lt.s32.totalorder %s230_s12, %s230_s12 }
 0x1e9   :  { %p340_p8 = scmp.ne.s32.totalorder %s230_s12, %s339_s13  ;;  %p345_p10 = scmp.lt.s32.totalorder %s339_s13, %s339_s13 }
 0x1eb   :  { %p346_p11 = por %p345_p10, %p344_p9 }
 0x1ed   :  { %p347_p12 = pnand %p346_p11, %p340_p8 }
 0x24f   :  { %v210_v35 = vpop.permute.xlu0 %209 }
 0x250   :  { %212 = vst.msk [vmem:[#allocation4] sm:$0x3] %vm206_vm3, %v210_v35 }
 0x251   :  { %350 = shalt.err (!%p347_p12)
}
 0x252   :  { %s351_s16 = scalar_lea.hbm %s483_s6, 32 }
 0x253   :  { %p352_p13 = scmp.ne.s32.totalorder %s483_s6, %s351_s16  ;;  %p355_p0 = scmp.lt.u32.totalorder %s351_s16, %s483_s6 }
 0x255   :  { %p357_p1 = pnand %p355_p0, %p352_p13 }
 0x257   :  { %360 = shalt.err (!%p357_p1)
}
 0x258   :  { %232 = dma.vmem_to_hbm [thread:$0]  %s230_s12, 32, %s483_s6, [#allocation5]  }
 0x259   :  { %361 = dma.done.wait [#allocation3], 32  }
 0x25a   :  { %362 = vsyncadd [#allocation3], 4294967264 }
 0x25b   :  { %363 = dma.done.wait [#allocation5], 32  }
 0x25c   :  { %364 = vsyncadd [#allocation5], 4294967264 }
 0x25d   :  { %239 = vsyncpa [#allocation3], 1 }
 0x25e   :  { %240 = vsyncpa [#allocation5], 1 }

</bundles_post_ra>
